<compile_context>
chip_gen: v5e
topology: v5e:2x2
jax: 0.10.0
libtpu: 0.0.40
codegen_flags: <defaults>
</compile_context>

<pallas_src>
import jax
import jax.numpy as jnp
from jax.experimental import pallas as pl
from jax.experimental.pallas import tpu as pltpu


def _patch_merging_kernel(xe_ref, xo_ref, we_ref, wo_ref, b_ref, o_ref):
    """LayerNorm(4C) + bias-free Linear(4C -> N_pad) over merged-patch rows.

    xe_ref: (th, W2, 2C)  even image rows -> torch channels [x0 | x2]
    xo_ref: (th, W2, 2C)  odd image rows  -> torch channels [x1 | x3]
    we_ref: (2C, N_pad)   gamma-folded weight rows for the [x0 | x2] channels
    wo_ref: (2C, N_pad)   gamma-folded weight rows for the [x1 | x3] channels
    b_ref:  (1, N_pad)    beta @ W (f32)
    o_ref:  (th*W2, N_pad)
    """
    th, w2, c2 = xe_ref.shape
    rows = th * w2
    inv_c4 = 1.0 / (2 * c2)                       # 1 / (4*C)

    xe = xe_ref[...].reshape(rows, c2).astype(jnp.float32)
    xo = xo_ref[...].reshape(rows, c2).astype(jnp.float32)

    # LayerNorm statistics over the full 4C merged-channel axis (two-pass,
    # numerically safe; channel order is a permutation -> stats unchanged).
    mean = (jnp.sum(xe, axis=-1, keepdims=True)
            + jnp.sum(xo, axis=-1, keepdims=True)) * inv_c4
    xe_c = xe - mean
    xo_c = xo - mean
    var = (jnp.sum(xe_c * xe_c, axis=-1, keepdims=True)
           + jnp.sum(xo_c * xo_c, axis=-1, keepdims=True)) * inv_c4
    inv = jax.lax.rsqrt(var + 1e-5)

    # gamma/beta are folded into we/wo/b in the wrapper; cast the normalized
    # activations to the weight dtype so bf16 weights use the bf16 MXU path.
    xn_e = (xe_c * inv).astype(we_ref.dtype)
    xn_o = (xo_c * inv).astype(wo_ref.dtype)
    acc = jnp.dot(xn_e, we_ref[...], preferred_element_type=jnp.float32)
    acc = acc + jnp.dot(xn_o, wo_ref[...], preferred_element_type=jnp.float32)
    o_ref[...] = (acc + b_ref[...]).astype(o_ref.dtype)


def _vmem_capacity_bytes():
    try:
        return int(pltpu.get_tpu_info().vmem_capacity_bytes)
    except Exception:
        return 64 * 1024 * 1024          # conservative (v7x-sized) fallback


def _choose_row_tile(bh2, w2, c4, n_pad, in_isz, w_isz, out_isz, vmem_budget,
                     rows_cap=2048):
    """Largest th (a divisor of B*H/2) whose tile fits the VMEM budget."""
    # Grid-invariant operands (default pipeline double-buffers them; single-
    # buffering via pl.Buffered(1) would free this at very large C).
    fixed = 2 * c4 * n_pad * w_isz + 2 * n_pad * 4
    # Per merged-patch row: pipelined inputs/outputs + f32 working set.
    per_row = (2 * c4 * in_isz           # xe + xo blocks, double-buffered
               + 2 * n_pad * out_isz     # output block, double-buffered
               + 16 * c4 + 8 * n_pad)    # f32 temporaries inside the body
    divisors = [d for d in range(1, bh2 + 1) if bh2 % d == 0]
    # Output-block second-minor dim must be a multiple of 8 (or the full M).
    valid = [d for d in divisors if (d * w2) % 8 == 0 or d == bh2]
    feasible = [d for d in valid
                if d * w2 <= rows_cap and fixed + d * w2 * per_row <= vmem_budget]
    if not feasible:
        return min(valid) if valid else bh2
    th = max(feasible)
    if bh2 // th == 1:                   # keep both v7x TensorCores busy
        multi = [d for d in feasible if bh2 // d >= 2]
        if multi and 2 * max(multi) >= th:
            th = max(multi)
    return th


def patch_merging(x, input_resolution, gamma, beta, w_reduction):
    """x: (B, H*W, C) -> (B, H/2*W/2, 2C). Matches PatchMerging.forward.

    gamma/beta: LayerNorm(4*dim) weight/bias, shape (4C,).
    w_reduction: Linear(4*dim, 2*dim, bias=False) weight, stored transposed
                 as (4C, 2C) so the op is y @ W.
    """
    H, W = input_resolution
    B, L, C = x.shape
    assert L == H * W, "input feature has wrong size"
    assert H % 2 == 0 and W % 2 == 0, f"x size ({H}*{W}) are not even."

    H2, W2 = H // 2, W // 2
    BH2 = B * H2
    L2 = H2 * W2
    M = B * L2
    C4, C2out = 4 * C, 2 * C
    C2in = 2 * C                                    # channels per even/odd plane
    N_pad = ((C2out + 127) // 128) * 128            # lane-dense output width

    # ---- free row-major view: (B, H*W, C) -> (B*H/2, 2, W/2, 2C) -----------
    # axis 1 picks the even (0) / odd (1) image row of each 2x2 patch; the last
    # axis packs the two adjacent columns: [x(., 2w2, :) | x(., 2w2+1, :)].
    xb = x.reshape(BH2, 2, W2, C2in)

    # ---- fold LayerNorm affine into the reduction weight --------------------
    w32 = w_reduction.astype(jnp.float32)
    w_eff = gamma.astype(jnp.float32)[:, None] * w32               # (4C, 2C)
    # even plane carries torch channels [0:C] (x0) and [2C:3C] (x2);
    # odd  plane carries torch channels [C:2C] (x1) and [3C:4C] (x3).
    we = jnp.concatenate([w_eff[0:C], w_eff[2 * C:3 * C]], axis=0)  # (2C, 2C)
    wo = jnp.concatenate([w_eff[C:2 * C], w_eff[3 * C:4 * C]], axis=0)
    b_row = beta.astype(jnp.float32) @ w32                          # (2C,)
    if N_pad != C2out:
        we = jnp.pad(we, ((0, 0), (0, N_pad - C2out)))
        wo = jnp.pad(wo, ((0, 0), (0, N_pad - C2out)))
        b_row = jnp.pad(b_row, (0, N_pad - C2out))
    we = we.astype(w_reduction.dtype)       # bf16 weights stay bf16 on the MXU
    wo = wo.astype(w_reduction.dtype)
    b_row = b_row.reshape(1, N_pad)

    # ---- per-device tile sizing ---------------------------------------------
    vmem_cap = _vmem_capacity_bytes()
    th = _choose_row_tile(
        BH2, W2, C4, N_pad,
        in_isz=jnp.dtype(x.dtype).itemsize,
        w_isz=jnp.dtype(we.dtype).itemsize,
        out_isz=jnp.dtype(x.dtype).itemsize,
        vmem_budget=int(0.45 * vmem_cap))
    rows = th * W2

    out = pl.pallas_call(
        _patch_merging_kernel,
        out_shape=jax.ShapeDtypeStruct((M, N_pad), x.dtype),
        grid_spec=pltpu.PrefetchScalarGridSpec(
            num_scalar_prefetch=0,
            grid=(BH2 // th,),
            in_specs=[
                # even / odd image-row planes of the same HBM array
                pl.BlockSpec((th, None, W2, C2in), lambda i: (i, 0, 0, 0)),
                pl.BlockSpec((th, None, W2, C2in), lambda i: (i, 1, 0, 0)),
                # grid-invariant folded weights + bias
                pl.BlockSpec((C2in, N_pad), lambda i: (0, 0)),
                pl.BlockSpec((C2in, N_pad), lambda i: (0, 0)),
                pl.BlockSpec((1, N_pad), lambda i: (0, 0)),
            ],
            out_specs=pl.BlockSpec((rows, N_pad), lambda i: (i, 0)),
        ),
        compiler_params=pltpu.CompilerParams(
            dimension_semantics=("parallel",),
            vmem_limit_bytes=int(0.8 * vmem_cap),
        ),
    )(xb, xb, we, wo, b_row)

    if N_pad != C2out:
        out = out[:, :C2out]
    return out.reshape(B, L2, C2out)


def _reference(x, input_resolution, gamma, beta, w_reduction):
    H, W = input_resolution
    B, L, C = x.shape
    xv = x.reshape(B, H, W, C)
    x0 = xv[:, 0::2, 0::2, :]
    x1 = xv[:, 1::2, 0::2, :]
    x2 = xv[:, 0::2, 1::2, :]
    x3 = xv[:, 1::2, 1::2, :]
    xm = jnp.concatenate([x0, x1, x2, x3], axis=-1).reshape(B, -1, 4 * C)
    mean = jnp.mean(xm, axis=-1, keepdims=True)
    var = jnp.mean((xm - mean) ** 2, axis=-1, keepdims=True)
    xn = (xm - mean) / jnp.sqrt(var + 1e-5)
    y = xn * gamma + beta
    return jnp.einsum("blk,kn->bln", y, w_reduction)


if __name__ == "__main__":
    key = jax.random.PRNGKey(0)
    B, H, W, C = 2, 16, 16, 32           # dim=32 -> 4*dim=128, 2*dim=64
    k_x, k_w, k_g, k_b = jax.random.split(key, 4)

    x = jax.random.normal(k_x, (B, H * W, C), dtype=jnp.float32)

    # Deterministic synthetic parameters (shapes from __init__):
    #   reduction: Linear(4*dim, 2*dim, bias=False) -> torch weight (2*dim, 4*dim);
    #              stored transposed as (4*dim, 2*dim) for y @ W.
    #   norm:      LayerNorm(4*dim) -> gamma/beta (4*dim,)
    w_reduction = 0.02 * jax.random.normal(k_w, (4 * C, 2 * C), dtype=jnp.float32)
    gamma = 1.0 + 0.01 * jax.random.normal(k_g, (4 * C,), dtype=jnp.float32)
    beta = 0.01 * jax.random.normal(k_b, (4 * C,), dtype=jnp.float32)

    out = patch_merging(x, (H, W), gamma, beta, w_reduction)
    out = jax.block_until_ready(out)

    ref = _reference(x, (H, W), gamma, beta, w_reduction)
    assert out.shape == (B, (H // 2) * (W // 2), 2 * C)
    assert jnp.allclose(out, ref, atol=2e-4, rtol=2e-4), \
        float(jnp.max(jnp.abs(out - ref)))

    print("KERNEL_OK")
</pallas_src>

<mosaic_0001>
module attributes {stable_mosaic.version = 11 : i64} {
  func.func @_patch_merging_kernel(%arg0: i32, %arg1: memref<8x1x8x64xf32, #tpu.memory_space<vmem>>, %arg2: memref<8x1x8x64xf32, #tpu.memory_space<vmem>>, %arg3: memref<64x128xf32, #tpu.memory_space<vmem>>, %arg4: memref<64x128xf32, #tpu.memory_space<vmem>>, %arg5: memref<1x128xf32, #tpu.memory_space<vmem>>, %arg6: memref<64x128xf32, #tpu.memory_space<vmem>>) attributes {dimension_semantics = [#tpu.dimension_semantics<parallel>], iteration_bounds = array<i64: 2>, scalar_prefetch = 0 : i64, scratch_operands = 0 : i64, tpu.core_type = #tpu.core_type<tc>, window_params = [{transform_indices = @transform_0, window_bounds = array<i64: 8, 1, 8, 64>}, {transform_indices = @transform_1, window_bounds = array<i64: 8, 1, 8, 64>}, {pipeline_mode = #tpu.pipeline_mode<synchronous>, transform_indices = @transform_2, window_bounds = array<i64: 64, 128>}, {pipeline_mode = #tpu.pipeline_mode<synchronous>, transform_indices = @transform_3, window_bounds = array<i64: 64, 128>}, {pipeline_mode = #tpu.pipeline_mode<synchronous>, transform_indices = @transform_4, window_bounds = array<i64: 1, 128>}, {transform_indices = @transform_5, window_bounds = array<i64: 64, 128>}]} {
    %c0 = arith.constant 0 : index
    %c0_0 = arith.constant 0 : index
    %c0_1 = arith.constant 0 : index
    %c0_2 = arith.constant 0 : index
    %0 = vector.load %arg1[%c0, %c0_0, %c0_1, %c0_2] : memref<8x1x8x64xf32, #tpu.memory_space<vmem>>, vector<8x1x8x64xf32>
    %1 = vector.shape_cast %0 : vector<8x1x8x64xf32> to vector<8x8x64xf32>
    %2 = vector.shape_cast %1 : vector<8x8x64xf32> to vector<64x64xf32>
    %c0_3 = arith.constant 0 : index
    %c0_4 = arith.constant 0 : index
    %c0_5 = arith.constant 0 : index
    %c0_6 = arith.constant 0 : index
    %3 = vector.load %arg2[%c0_3, %c0_4, %c0_5, %c0_6] : memref<8x1x8x64xf32, #tpu.memory_space<vmem>>, vector<8x1x8x64xf32>
    %4 = vector.shape_cast %3 : vector<8x1x8x64xf32> to vector<8x8x64xf32>
    %5 = vector.shape_cast %4 : vector<8x8x64xf32> to vector<64x64xf32>
    %cst = arith.constant dense<0.000000e+00> : vector<64xf32>
    %6 = vector.multi_reduction <add>, %2, %cst [1] : vector<64x64xf32> to vector<64xf32>
    %7 = vector.shape_cast %6 : vector<64xf32> to vector<64x1xf32>
    %cst_7 = arith.constant dense<0.000000e+00> : vector<64xf32>
    %8 = vector.multi_reduction <add>, %5, %cst_7 [1] : vector<64x64xf32> to vector<64xf32>
    %9 = vector.shape_cast %8 : vector<64xf32> to vector<64x1xf32>
    %10 = arith.addf %7, %9 : vector<64x1xf32>
    %cst_8 = arith.constant 7.812500e-03 : f32
    %11 = vector.broadcast %cst_8 : f32 to vector<64x1xf32>
    %12 = arith.mulf %10, %11 : vector<64x1xf32>
    %13 = vector.broadcast %12 : vector<64x1xf32> to vector<64x64xf32>
    %14 = arith.subf %2, %13 : vector<64x64xf32>
    %15 = vector.broadcast %12 : vector<64x1xf32> to vector<64x64xf32>
    %16 = arith.subf %5, %15 : vector<64x64xf32>
    %17 = arith.mulf %14, %14 : vector<64x64xf32>
    %cst_9 = arith.constant dense<0.000000e+00> : vector<64xf32>
    %18 = vector.multi_reduction <add>, %17, %cst_9 [1] : vector<64x64xf32> to vector<64xf32>
    %19 = vector.shape_cast %18 : vector<64xf32> to vector<64x1xf32>
    %20 = arith.mulf %16, %16 : vector<64x64xf32>
    %cst_10 = arith.constant dense<0.000000e+00> : vector<64xf32>
    %21 = vector.multi_reduction <add>, %20, %cst_10 [1] : vector<64x64xf32> to vector<64xf32>
    %22 = vector.shape_cast %21 : vector<64xf32> to vector<64x1xf32>
    %23 = arith.addf %19, %22 : vector<64x1xf32>
    %cst_11 = arith.constant 7.812500e-03 : f32
    %24 = vector.broadcast %cst_11 : f32 to vector<64x1xf32>
    %25 = arith.mulf %23, %24 : vector<64x1xf32>
    %cst_12 = arith.constant 9.99999974E-6 : f32
    %26 = vector.broadcast %cst_12 : f32 to vector<64x1xf32>
    %27 = arith.addf %25, %26 : vector<64x1xf32>
    %28 = math.rsqrt %27 : vector<64x1xf32>
    %29 = vector.broadcast %28 : vector<64x1xf32> to vector<64x64xf32>
    %30 = arith.mulf %14, %29 : vector<64x64xf32>
    %31 = vector.broadcast %28 : vector<64x1xf32> to vector<64x64xf32>
    %32 = arith.mulf %16, %31 : vector<64x64xf32>
    %c0_13 = arith.constant 0 : index
    %c0_14 = arith.constant 0 : index
    %33 = vector.load %arg3[%c0_13, %c0_14] : memref<64x128xf32, #tpu.memory_space<vmem>>, vector<64x128xf32>
    %cst_15 = arith.constant dense<0.000000e+00> : vector<64x128xf32>
    %34 = tpu.matmul %30, %33, %cst_15 {dimension_numbers = #tpu.dot_dimension_numbers<[1], [0], [0], [1], [0, 0, 1, 1], [], []>} : vector<64x64xf32>, vector<64x128xf32>, vector<64x128xf32> -> vector<64x128xf32>
    %c0_16 = arith.constant 0 : index
    %c0_17 = arith.constant 0 : index
    %35 = vector.load %arg4[%c0_16, %c0_17] : memref<64x128xf32, #tpu.memory_space<vmem>>, vector<64x128xf32>
    %cst_18 = arith.constant dense<0.000000e+00> : vector<64x128xf32>
    %36 = tpu.matmul %32, %35, %cst_18 {dimension_numbers = #tpu.dot_dimension_numbers<[1], [0], [0], [1], [0, 0, 1, 1], [], []>} : vector<64x64xf32>, vector<64x128xf32>, vector<64x128xf32> -> vector<64x128xf32>
    %37 = arith.addf %34, %36 : vector<64x128xf32>
    %c0_19 = arith.constant 0 : index
    %c0_20 = arith.constant 0 : index
    %38 = vector.load %arg5[%c0_19, %c0_20] : memref<1x128xf32, #tpu.memory_space<vmem>>, vector<1x128xf32>
    %39 = vector.broadcast %38 : vector<1x128xf32> to vector<64x128xf32>
    %40 = arith.addf %37, %39 : vector<64x128xf32>
    %c0_21 = arith.constant 0 : index
    %c0_22 = arith.constant 0 : index
    %41 = vector.load %arg6[%c0_21, %c0_22] : memref<64x128xf32, #tpu.memory_space<vmem>>, vector<64x128xf32>
    tpu.vector_store %arg6[%c0_21, %c0_22], %40 {strides = array<i32>} : memref<64x128xf32, #tpu.memory_space<vmem>>, vector<64x128xf32>,
    return
  }
  func.func @transform_0(%arg0: i32) -> (i32, i32, i32, i32) {
    %c0_i32 = arith.constant 0 : i32
    %c0_i32_0 = arith.constant 0 : i32
    %c0_i32_1 = arith.constant 0 : i32
    %c0_i32_2 = arith.constant 0 : i32
    return %arg0, %c0_i32, %c0_i32_0, %c0_i32_1 : i32, i32, i32, i32
  }
  func.func @transform_1(%arg0: i32) -> (i32, i32, i32, i32) {
    %c1_i32 = arith.constant 1 : i32
    %c0_i32 = arith.constant 0 : i32
    %c0_i32_0 = arith.constant 0 : i32
    %c0_i32_1 = arith.constant 0 : i32
    return %arg0, %c1_i32, %c0_i32, %c0_i32_0 : i32, i32, i32, i32
  }
  func.func @transform_2(%arg0: i32) -> (i32, i32) {
    %c0_i32 = arith.constant 0 : i32
    %c0_i32_0 = arith.constant 0 : i32
    %c0_i32_1 = arith.constant 0 : i32
    return %c0_i32, %c0_i32_0 : i32, i32
  }
  func.func @transform_3(%arg0: i32) -> (i32, i32) {
    %c0_i32 = arith.constant 0 : i32
    %c0_i32_0 = arith.constant 0 : i32
    %c0_i32_1 = arith.constant 0 : i32
    return %c0_i32, %c0_i32_0 : i32, i32
  }
  func.func @transform_4(%arg0: i32) -> (i32, i32) {
    %c0_i32 = arith.constant 0 : i32
    %c0_i32_0 = arith.constant 0 : i32
    %c0_i32_1 = arith.constant 0 : i32
    return %c0_i32, %c0_i32_0 : i32, i32
  }
  func.func @transform_5(%arg0: i32) -> (i32, i32) {
    %c0_i32 = arith.constant 0 : i32
    %c0_i32_0 = arith.constant 0 : i32
    return %arg0, %c0_i32 : i32, i32
  }
}

</mosaic_0001>

<bundles_post_ra>
// kernel: tpu_custom_call.1
= control target key start
LH: loop header
LB: loop body
LE: loop exit
PB: predicated region body
PF: predicated region fallthrough
CT: control target
= control target key end

     0   :  { %s1698_s0 = inlined_call_operand.hbm [shape: f32[16,2,8,64], index: 0, kind: input, shape index: {}]   ;;  %s1699_s1 = inlined_call_operand.hbm [shape: f32[16,2,8,64], index: 1, kind: input, shape index: {}]   ;;  %s1700_s2 = inlined_call_operand.hbm [shape: f32[64,128], index: 2, kind: input, shape index: {}]   ;;  %s1701_s3 = inlined_call_operand.hbm [shape: f32[64,128], index: 3, kind: input, shape index: {}]   ;;  %s1702_s4 = inlined_call_operand.vmem [shape: f32[1,128], index: 4, kind: input, shape index: {}]   ;;  %s1703_s5 = inlined_call_operand.hbm [shape: f32[128,128], index: 5, kind: output, shape index: {}]  }
   0x1   :  { %1709 = sst [smem:[#allocation18_spill]] %s1698_s0 }
   0x2   :  { %1710 = sst [smem:[#allocation19_spill]] %s1700_s2 }
   0x3   :  { %1711 = sst [smem:[#allocation20_spill]] %s1701_s3 }
   0x4   :  { %10 = vsyncpa [#allocation3], 0 }
   0x5   :  { %12 = vsyncpa [#allocation3 + $0x1], 0 }
   0x6   :  { %13 = vsyncpa [#allocation6], 0 }
   0x7   :  { %15 = vsyncpa [#allocation6 + $0x1], 0 }
   0x8   :  { %16 = vsyncpa [#allocation9], 0 }
   0x9   :  { %17 = vsyncpa [#allocation4], 0 }
   0xa   :  { %19 = vsyncpa [#allocation4 + $0x1], 0  ;;  %s1296_s18 = smov 0   ;;  %s1298_s19 = smov 0  }
   0xb   :  { %s1300_s20 = smov 0   ;;  %s1302_s21 = smov 0  }
   0xc LB: > { %1712 = sst [smem:[#allocation16_spill]] %s1253_s20  ;;  %s1317_s22 = sadd.s32 4294967295, %s1257_s21   ;;  %s1257_s21 = sphi %s1302_s21, %s1729_s21   ;;  %s1253_s20 = sphi %s1300_s20, %s1726_s20   ;;  %s1249_s19 = sphi %s1298_s19, %s1728_s19   ;;  %s1245_s18 = sphi %s1296_s18, %s1727_s18  }
   0xd   : > { %s906_s23 = sadd.s32 4294967294, %s1257_s21   ;;  %p45_p0 = scmp.ne.s32.totalorder %s1249_s19, %s1245_s18 }
   0xe   : > { %p46_p1 = scmp.eq.s32.totalorder %s1317_s22, 0  ;;  %p158_p2 = scmp.eq.s32.totalorder %s1317_s22, 1 }
   0xf   : > { %p164_p3 = scmp.eq.s32.totalorder %s906_s23, 1  ;;  %p907_p5 = scmp.ge.s32.totalorder %s1257_s21, 1 }
  0x10   : > { %p1326_p4 = por %p46_p1, %p45_p0  ;;  %p171_p7 = scmp.lt.s32.totalorder %s1257_s21, 3 }
  0x11   : > { %p1331_p6 = por %p164_p3, %p45_p0  ;;  %s1715_s2 = sld [smem:[#allocation19_spill]] }
  0x12   : > { %p1339_p8 = pnand %p907_p5, %p171_p7  ;;  %s1259_s30 = smov [#allocation7]  }
  0x13   : > { %s184_s6 = sshll.u32 %s1259_s30, 4  ;;  %s1717_s3 = sld [smem:[#allocation20_spill]]  ;;  %s185_s6 = int_to_ptr.vmem [resolvable:$true] %s184_s6 }
  0x14   : > { %p979_p9 = pneg %p1339_p8  ;;  %s1704_s10 = smov 128  }
  0x15   : > { %s1706_s11 = smov 8   ;;  %s1262_s12 = smov [#allocation8]  }
  0x16   : > { %p980_p10 = pnand %p979_p9, %p46_p1  ;;  %s198_s13 = sshll.u32 %s1262_s12, 4  ;;  %s199_s13 = int_to_ptr.vmem [resolvable:$true] %s198_s13 }
  0x17   : > { %s182_s28 = sshll.u32 %s1715_s2, 4  ;;  %s1358_s14 = sadd.s32 1, %s1257_s21   ;;  %s183_s28 = int_to_ptr.hbm [resolvable:$true] %s182_s28 }
  0x18   : > { %982 = dma.hbm_to_vmem [thread:$0]  (!%p980_p10), %s183_s28, 1024, %s185_s6, [#allocation6], %s1704_s10, %s1704_s10, %s1706_s11  }
  0x19   : > { %s196_s9 = sshll.u32 %s1717_s3, 4  ;;  %s32_s15 = sadd.s32 1, %s1253_s20  ;;  %s197_s9 = int_to_ptr.hbm [resolvable:$true] %s196_s9 }
  0x1a   : > { %985 = dma.hbm_to_vmem [thread:$0]  (!%p980_p10), %s197_s9, 1024, %s199_s13, [#allocation9], %s1704_s10, %s1704_s10, %s1706_s11  }
  0x1b   : > { %s29_s16 = ssub.s32 %s1257_s21, %s1358_s14  ;;  %p39_p12 = scmp.ne.s32.totalorder %s1253_s20, %s1249_s19 }
  0x1c   : > { %p30_p13 = scmp.eq.s32.totalorder %s29_s16, 0  ;;  %p40_p0 = scmp.eq.s32.totalorder %s1257_s21, 0 }
  0x1d   : > { %p1368_p3 = por %p158_p2, %p39_p12  ;;  %p999_p5 = scmp.lt.s32.totalorder %s1257_s21, 2 }
  0x1e   : > { %s1374_s23 = scalar_select %p30_p13, %s1253_s20, %s32_s15  }
  0x1f   : > { %p41_p7 = por %p40_p0, %p39_p12  ;;  %s215_s26 = sand.u32 1, %s1253_s20  }
  0x20   : > { %1719 = sst [smem:[#allocation17_spill]] %s1374_s23  ;;  %s1377_s27 = sshll.u32 %s215_s26, 6 }
  0x21   : > { %s946_s28 = sshll.u32 %s1257_s21, 7  ;;  %s1720_s0 = sld [smem:[#allocation18_spill]] }
  0x22   : > { %s219_s8 = scalar_lea.vmem [#allocation2], %s1377_s27  ;;  %p1384_p2 = pnand %p999_p5, %p41_p7 }
  0x23   : > { %s228_s9 = sshll.u32 %s219_s8, 4  ;;  %s830_s10 = scalar_lea.hbm %s1699_s1, %s946_s28  ;;  %s229_s9 = int_to_ptr.vmem [resolvable:$true] %s228_s9 }
  0x24   : > { %s216_s11 = scalar_lea.sflag [#allocation3], %s215_s26  ;;  %p1123_p10 = pneg %p1384_p2 }
  0x27   : > { %s225_s7 = scalar_lea.hbm %s1720_s0, %s946_s28  ;;  %s1126_s8 = scalar_lea.hbm %s1720_s0, 256 }
  0x28   : > { %s226_s12 = sshll.u32 %s225_s7, 4  ;;  %s227_s12 = int_to_ptr.hbm [resolvable:$true] %s226_s12 }
  0x29   : > { %s1119_s2 = sshra.s32 %s227_s12, 4  ;;  %s1120_s2 = int_to_ptr.hbm [resolvable:$true] %s1119_s2 }
  0x2a   : > { %s1121_s30 = scalar_lea.hbm %s1120_s2, 64  ;;  %p1127_p0 = scmp.lt.s32.totalorder %s1120_s2, %s1720_s0 }
  0x2b   : > { %p1122_p9 = scmp.ne.s32.totalorder %s1120_s2, %s1121_s30  ;;  %p1128_p5 = scmp.lt.s32.totalorder %s1126_s8, %s1121_s30 }
  0x2d   : > { %p1124_p12 = pnand %p1123_p10, %p1122_p9  ;;  %p1129_p7 = por %p1128_p5, %p1127_p0 }
  0x2f   : > { %p1125_p13 = pneg %p1124_p12 }
  0x31   : > { %p1130_p11 = pnand %p1129_p7, %p1125_p13 }
  0x33   : > { %1133 = shalt.err (!%p1130_p11)
}
  0x34   : > { %s1263_s26 = smov 256   ;;  %s1722_s28 = smov 8  }
  0x35   : > { %s1723_s16 = smov 128   ;;  %s831_s23 = scalar_lea.hbm %s830_s10, 8 }
  0x36   : > { %989 = dma.hbm_to_vmem [thread:$0]  (!%p1384_p2), %s227_s12, 1024, %s229_s9, %s216_s11, %s1263_s26, %s1723_s16, %s1722_s28  }
  0x37   : > { %s242_s6 = scalar_lea.vmem [#allocation5], %s1377_s27  ;;  %s250_s20 = sshll.u32 %s831_s23, 4  ;;  %s251_s20 = int_to_ptr.hbm [resolvable:$true] %s250_s20 }
  0x38   : > { %s252_s7 = sshll.u32 %s242_s6, 4  ;;  %s238_s2 = sand.u32 1, %s1257_s21   ;;  %s253_s7 = int_to_ptr.vmem [resolvable:$true] %s252_s7 }
  0x39   : > { %s239_s3 = scalar_lea.sflag [#allocation6], %s238_s2  ;;  %s1149_s30 = sshra.s32 %s251_s20, 4  ;;  %s1150_s30 = int_to_ptr.hbm [resolvable:$true] %s1149_s30 }
  0x3a   : > { %s1151_s8 = scalar_lea.hbm %s1150_s30, 64  ;;  %s1156_s11 = scalar_lea.hbm %s1699_s1, 256 }
  0x3b   : > { %p1152_p11 = scmp.ne.s32.totalorder %s1150_s30, %s1151_s8  ;;  %p1157_p13 = scmp.lt.s32.totalorder %s1150_s30, %s1699_s1 }
  0x3c   : > { %p1158_p0 = scmp.lt.s32.totalorder %s1156_s11, %s1151_s8 }
  0x3d   : > { %p1154_p9 = pnand %p1152_p11, %p1123_p10 }
  0x3e   : > { %p1159_p5 = por %p1158_p0, %p1157_p13 }
  0x3f   : > { %p1155_p12 = pneg %p1154_p9 }
  0x41   : > { %p1160_p7 = pnand %p1159_p5, %p1155_p12 }
  0x43   : > { %1163 = shalt.err (!%p1160_p7)
}
  0x44   : > { %992 = dma.hbm_to_vmem [thread:$0]  (!%p1384_p2), %s251_s20, 1024, %s253_s7, %s239_s3, %s1263_s26, %s1723_s16, %s1722_s28  }
  0x45   : > { %264 = sbr.rel (%p1339_p8) target bundleno = 533 (0x215), region = 40  ;;  %s1424_s0 = sand.u32 (!%p1339_p8), 1, %s1249_s19  }
  0x46   : > { %s1427_s23 = sshll.u32 (!%p1339_p8), %s1424_s0, 6  ;;  %s267_s9 = scalar_lea.sflag (!%p1339_p8), [#allocation3], %s1424_s0 }
  0x47   : > { %s1431_s12 = scalar_lea.vmem (!%p1339_p8), [#allocation2], %s1427_s23 }
  0x4a   : > { %1224 = dma.done.wait (%p1326_p4), %s267_s9, 1024  }
  0x4b   : > { %1226 = vsyncadd (%p1326_p4), %s267_s9, 4294966272  ;;  %s276_s20 = sand.u32 1, %s1317_s22   ;;  %s1439_s13 = scalar_lea.vmem [#allocation5], %s1427_s23 }
  0x4c   : > { %s277_s29 = scalar_lea.sflag [#allocation6], %s276_s20 }
  0x4d   : > { %1228 = dma.done.wait (%p1326_p4), %s277_s29, 1024  }
  0x4e   : > { %1230 = vsyncadd (%p1326_p4), %s277_s29, 4294966272 }
  0x4f   : > { %1232 = dma.done.wait (%p46_p1), [#allocation6], 1024  }
  0x50   : > { %1234 = vsyncadd (%p46_p1), [#allocation6], 4294966272 }
  0x51   : > { %1236 = dma.done.wait (%p46_p1), [#allocation9], 1024  }
  0x52   : > { %1238 = vsyncadd (%p46_p1), [#allocation9], 4294966272  ;;  %vm342_vm0 = vcmask 523264   ;;  %v330_v0 = vld [vmem:[%s1431_s12 + $0x20] sm:$0xff]  ;;  %v1456_v2 = vld [vmem:[%s1431_s12 + $0x28] sm:$0xff]  ;;  %s1654_s28 = scalar_lea.vmem [#allocation10], %s1427_s23 }
  0x53   : > { %v326_v1 = vld [vmem:[%s1431_s12] sm:$0xff]  ;;  %v355_v3 = vsel %vm342_vm0, %v330_v0, 0.0  ;;  %v358_v5 = vsel %vm342_vm0, %v1456_v2, 0.0  ;;  %v1465_v8 = vld [vmem:[%s1439_s13 + $0x28] sm:$0xff]  ;;  %v1478_v14 = vld [vmem:[%s1431_s12 + $0x30] sm:$0xff]  ;;  %s948_s16 = sshll.u32 %s1317_s22, 6 }
  0x54   : > { %v343_v4 = vsel %vm342_vm0, %v326_v1, 0.0  ;;  %356 = vadd.xlane.f32.xlu0 %v355_v3  ;;  %359 = vadd.xlane.f32.xlu2 %v358_v5  ;;  %v338_v6 = vld [vmem:[%s1439_s13 + $0x20] sm:$0xff]  ;;  %v382_v11 = vsel %vm342_vm0, %v1465_v8, 0.0  ;;  %v1472_v12 = vld [vmem:[%s1431_s12 + $0x8] sm:$0xff]  ;;  %v361_v17 = vsel %vm342_vm0, %v1478_v14, 0.0  ;;  %v1487_v18 = vld [vmem:[%s1439_s13 + $0x30] sm:$0xff]  ;;  %s785_s2 = scalar_lea.hbm %s1703_s5, %s948_s16 }
  0x55   : > { %344 = vadd.xlane.f32.xlu1 %v343_v4  ;;  %v334_v7 = vld [vmem:[%s1439_s13] sm:$0xff]  ;;  %v379_v9 = vsel %vm342_vm0, %v338_v6, 0.0  ;;  %v1475_v13 = vld [vmem:[%s1439_s13 + $0x8] sm:$0xff]  ;;  %v346_v15 = vsel %vm342_vm0, %v1472_v12, 0.0  ;;  %v1490_v19 = vld [vmem:[%s1431_s12 + $0x10] sm:$0xff]  ;;  %v385_v21 = vsel %vm342_vm0, %v1487_v18, 0.0 }
  0x56   : > { %v367_v10 = vsel %vm342_vm0, %v334_v7, 0.0  ;;  %v370_v16 = vsel %vm342_vm0, %v1475_v13, 0.0  ;;  %v1493_v20 = vld [vmem:[%s1439_s13 + $0x10] sm:$0xff]  ;;  %v349_v22 = vsel %vm342_vm0, %v1490_v19, 0.0  ;;  %v1502_v24 = vld [vmem:[%s1431_s12 + $0x38] sm:$0xff]  ;;  %s786_s3 = sshll.u32 %s1654_s28, 4  ;;  %s787_s3 = int_to_ptr.vmem [resolvable:$true] %s786_s3 }
  0x57   : > { %v373_v23 = vsel %vm342_vm0, %v1493_v20, 0.0  ;;  %v1505_v25 = vld [vmem:[%s1439_s13 + $0x38] sm:$0xff]  ;;  %v364_v27 = vsel %vm342_vm0, %v1502_v24, 0.0  ;;  %s788_s30 = sshll.u32 %s785_s2, 4  ;;  %s774_s22 = scalar_lea.sflag [#allocation4], %s1424_s0  ;;  %s789_s30 = int_to_ptr.hbm [resolvable:$true] %s788_s30 }
  0x58   : > { %v1508_v26 = vld [vmem:[%s1431_s12 + $0x18] sm:$0xff]  ;;  %v388_v28 = vsel %vm342_vm0, %v1505_v25, 0.0  ;;  %s1193_s8 = sshra.s32 %s789_s30, 4  ;;  %s1199_s27 = scalar_lea.hbm %s1703_s5, 128  ;;  %s1194_s8 = int_to_ptr.hbm [resolvable:$true] %s1193_s8 }
  0x59   : > { %v352_v29 = vsel %vm342_vm0, %v1508_v26, 0.0  ;;  %v1517_v30 = vld [vmem:[%s1439_s13 + $0x18] sm:$0xff]  ;;  %s1195_s15 = scalar_lea.hbm %s1194_s8, 64  ;;  %p1200_p2 = scmp.lt.s32.totalorder %s1194_s8, %s1703_s5 }
  0x5a   : > { %v376_v31 = vsel %vm342_vm0, %v1517_v30, 0.0  ;;  %p1196_p1 = scmp.ne.s32.totalorder %s1194_s8, %s1195_s15  ;;  %p1201_p10 = scmp.lt.s32.totalorder %s1199_s27, %s1195_s15 }
  0x5c   : > { %380 = vadd.xlane.f32.xlu0 %v379_v9  ;;  %383 = vadd.xlane.f32.xlu2 %v382_v11  ;;  %p1197_p4 = pnand %p1196_p1, %p1368_p3  ;;  %p1202_p11 = por %p1201_p10, %p1200_p2 }
  0x5d   : > { %368 = vadd.xlane.f32.xlu1 %v367_v10 }
  0x5e   : > { %p1198_p8 = pneg %p1197_p4 }
  0x60   : > { %p1203_p9 = pnand %p1202_p11, %p1198_p8 }
  0x64   : > { %347 = vadd.xlane.f32.xlu0 %v346_v15  ;;  %362 = vadd.xlane.f32.xlu2 %v361_v17 }
  0x65   : > { %371 = vadd.xlane.f32.xlu1 %v370_v16 }
  0x6c   : > { %386 = vadd.xlane.f32.xlu0 %v385_v21  ;;  %374 = vadd.xlane.f32.xlu2 %v373_v23 }
  0x6d   : > { %350 = vadd.xlane.f32.xlu1 %v349_v22 }
  0x74   : > { %365 = vadd.xlane.f32.xlu0 %v364_v27  ;;  %353 = vadd.xlane.f32.xlu2 %v352_v29 }
  0x75   : > { %389 = vadd.xlane.f32.xlu1 %v388_v28 }
  0x7c   : > { %377 = vadd.xlane.f32.xlu0 %v376_v31 }
  0xc7   : > { %v357_v32 = vpop.xlane.xlu0 %356  ;;  %v360_v34 = vpop.xlane.xlu2 %359 }
  0xc8   : > { %v345_v33 = vpop.xlane.xlu1 %344 }
  0xcf   : > { %v381_v35 = vpop.xlane.xlu0 %380  ;;  %v384_v39 = vpop.xlane.xlu2 %383 }
  0xd0   : > { %v369_v36 = vpop.xlane.xlu1 %368  ;;  %v395_v37 = vadd.f32 %v381_v35, %v357_v32  ;;  %v396_v40 = vadd.f32 %v384_v39, %v360_v34 }
  0xd1   : > { %v391_v38 = vadd.f32 %v369_v36, %v345_v33 }
  0xd2   : > { %v403_v41 = vmul.f32 0.0078125, %v395_v37  ;;  %v404_v43 = vmul.f32 0.0078125, %v396_v40 }
  0xd3   : > { %v399_v42 = vmul.f32 0.0078125, %v391_v38 }
  0xd4   : > { %v1521_v44 = vsub.f32 %v330_v0, %v403_v41  ;;  %v1523_v45 = vsub.f32 %v338_v6, %v403_v41  ;;  %v1536_v51 = vsub.f32 %v1456_v2, %v404_v43  ;;  %v1542_v59 = vsub.f32 %v1465_v8, %v404_v43 }
  0xd5   : > { %v1525_v46 = vsub.f32 %v326_v1, %v399_v42  ;;  %v1533_v50 = vsub.f32 %v334_v7, %v399_v42 }
  0xd6   : > { %v459_v47 = vmul.f32 %v1523_v45, %v1523_v45  ;;  %v427_v48 = vmul.f32 %v1521_v44, %v1521_v44  ;;  %v428_v61 = vmul.f32 %v1536_v51, %v1536_v51  ;;  %v460_v63 = vmul.f32 %v1542_v59, %v1542_v59 }
  0xd7   : > { %v423_v49 = vmul.f32 %v1525_v46, %v1525_v46  ;;  %v348_v52 = vpop.xlane.xlu0 %347  ;;  %v363_v57 = vpop.xlane.xlu2 %362  ;;  %v455_v62 = vmul.f32 %v1533_v50, %v1533_v50 }
  0xd8   : > { %v372_v53 = vpop.xlane.xlu1 %371  ;;  %v475_v54 = vsel %vm342_vm0, %v459_v47, 0.0  ;;  %v443_v55 = vsel %vm342_vm0, %v427_v48, 0.0  ;;  %v446_v5 = vsel %vm342_vm0, %v428_v61, 0.0  ;;  %v478_v8 = vsel %vm342_vm0, %v460_v63, 0.0  ;;  %v611_v61 = vld [vmem:[#allocation7 + $0x20] sm:$0xff]  ;;  %v610_v63 = vld [vmem:[#allocation7 + $0x18] sm:$0xff] }
  0xd9   : > { %v431_v56 = vsel %vm342_vm0, %v423_v49, 0.0  ;;  %v392_v58 = vadd.f32 %v372_v53, %v348_v52  ;;  %476 = vadd.xlane.f32.xlu2 %v475_v54  ;;  %444 = vadd.xlane.f32.xlu1 %v443_v55  ;;  %v463_v6 = vsel %vm342_vm0, %v455_v62, 0.0  ;;  %v614_v54 = vld [vmem:[#allocation7 + $0x38] sm:$0xff]  ;;  %v621_v55 = vld [vmem:[#allocation8 + $0x30] sm:$0xff] }
  0xda   : > { %432 = vadd.xlane.f32.xlu0 %v431_v56  ;;  %957 = vmatpush.msra.mxu3 %v614_v54  ;;  %v613_v56 = vld [vmem:[#allocation7 + $0x30] sm:$0xff]  ;;  %v618_v62 = vld [vmem:[#allocation8 + $0x18] sm:$0xff] }
  0xdb   : > { %v400_v60 = vmul.f32 0.0078125, %v392_v58  ;;  %720 = vmatpush.msra.mxu1 %v614_v54  ;;  %v612_v58 = vld [vmem:[#allocation7 + $0x28] sm:$0xff] }
  0xdc   : > { %958 = vmatpush.msra.mxu3 %v613_v56 }
  0xdd   : > { %v1551_v0 = vsub.f32 %v1472_v12, %v400_v60  ;;  %v1554_v1 = vsub.f32 %v1475_v13, %v400_v60  ;;  %721 = vmatpush.msra.mxu1 %v613_v56  ;;  %v619_v60 = vld [vmem:[#allocation8 + $0x20] sm:$0xff] }
  0xde   : > { %959 = vmatpush.msra.mxu3 %v612_v58 }
  0xdf   : > { %v387_v2 = vpop.xlane.xlu0 %386  ;;  %v375_v7 = vpop.xlane.xlu2 %374  ;;  %v456_v11 = vmul.f32 %v1554_v1, %v1554_v1  ;;  %v424_v12 = vmul.f32 %v1551_v0, %v1551_v0  ;;  %722 = vmatpush.msra.mxu1 %v612_v58 }
  0xe0   : > { %v351_v3 = vpop.xlane.xlu1 %350  ;;  %v397_v4 = vadd.f32 %v387_v2, %v363_v57  ;;  %v620_v57 = vld [vmem:[#allocation8 + $0x28] sm:$0xff]  ;;  %960 = vmatpush.msra.mxu3 %v611_v61  ;;  %v617_v2 = vld [vmem:[#allocation8 + $0x10] sm:$0xff] }
  0xe1   : > { %447 = vadd.xlane.f32.xlu2 %v446_v5  ;;  %464 = vadd.xlane.f32.xlu1 %v463_v6  ;;  %v393_v9 = vadd.f32 %v375_v7, %v351_v3  ;;  %v466_v21 = vsel %vm342_vm0, %v456_v11, 0.0  ;;  %v434_v22 = vsel %vm342_vm0, %v424_v12, 0.0  ;;  %v609_v3 = vld [vmem:[#allocation7 + $0x10] sm:$0xff]  ;;  %v608_v5 = vld [vmem:[#allocation7 + $0x8] sm:$0xff]  ;;  %v615_v6 = vld [vmem:[#allocation8] sm:$0xff] }
  0xe2   : > { %v405_v10 = vmul.f32 0.0078125, %v397_v4  ;;  %479 = vadd.xlane.f32.xlu0 %v478_v8  ;;  %723 = vmatpush.msra.mxu1 %v611_v61  ;;  %v616_v4 = vld [vmem:[#allocation8 + $0x8] sm:$0xff]  ;;  %v607_v7 = vld [vmem:[#allocation7] sm:$0xff] }
  0xe3   : > { %v401_v13 = vmul.f32 0.0078125, %v393_v9  ;;  %961 = vmatpush.msra.mxu3 %v610_v63 }
  0xe4   : > { %v1564_v15 = vsub.f32 %v1478_v14, %v405_v10  ;;  %v1577_v29 = vsub.f32 %v1487_v18, %v405_v10  ;;  %724 = vmatpush.msra.mxu1 %v610_v63 }
  0xe5   : > { %v1567_v16 = vsub.f32 %v1490_v19, %v401_v13  ;;  %v1574_v23 = vsub.f32 %v1493_v20, %v401_v13  ;;  %962 = vmatpush.msra.mxu3 %v609_v3 }
  0xe6   : > { %v429_v17 = vmul.f32 %v1564_v15, %v1564_v15  ;;  %v461_v20 = vmul.f32 %v1577_v29, %v1577_v29  ;;  %725 = vmatpush.msra.mxu1 %v609_v3 }
  0xe7   : > { %v366_v27 = vpop.xlane.xlu0 %365  ;;  %v425_v32 = vmul.f32 %v1567_v16, %v1567_v16  ;;  %v457_v33 = vmul.f32 %v1574_v23, %v1574_v23  ;;  %v354_v34 = vpop.xlane.xlu2 %353  ;;  %963 = vmatpush.msra.mxu3 %v608_v5 }
  0xe8   : > { %v390_v28 = vpop.xlane.xlu1 %389  ;;  %v449_v14 = vsel %vm342_vm0, %v429_v17, 0.0  ;;  %v481_v39 = vsel %vm342_vm0, %v461_v20, 0.0  ;;  %726 = vmatpush.msra.mxu1 %v608_v5 }
  0xe9   : > { %v398_v31 = vadd.f32 %v390_v28, %v366_v27  ;;  %467 = vadd.xlane.f32.xlu2 %v466_v21  ;;  %435 = vadd.xlane.f32.xlu1 %v434_v22  ;;  %v437_v36 = vsel %vm342_vm0, %v425_v32, 0.0  ;;  %v469_v37 = vsel %vm342_vm0, %v457_v33, 0.0 }
  0xea   : > { %450 = vadd.xlane.f32.xlu0 %v449_v14  ;;  %964 = vmatpush.msra.mxu3 %v607_v7 }
  0xeb   : > { %v406_v19 = vmul.f32 0.0078125, %v398_v31  ;;  %727 = vmatpush.msra.mxu1 %v607_v7 }
  0xed   : > { %v1587_v18 = vsub.f32 %v1502_v24, %v406_v19  ;;  %v1590_v35 = vsub.f32 %v1505_v25, %v406_v19 }
  0xef   : > { %v378_v38 = vpop.xlane.xlu0 %377  ;;  %v462_v42 = vmul.f32 %v1590_v35, %v1590_v35  ;;  %v430_v24 = vmul.f32 %v1587_v18, %v1587_v18 }
  0xf0   : > { %v394_v40 = vadd.f32 %v378_v38, %v354_v34 }
  0xf1   : > { %482 = vadd.xlane.f32.xlu1 %v481_v39  ;;  %438 = vadd.xlane.f32.xlu2 %v437_v36  ;;  %v484_v47 = vsel %vm342_vm0, %v462_v42, 0.0  ;;  %v452_v48 = vsel %vm342_vm0, %v430_v24, 0.0 }
  0xf2   : > { %470 = vadd.xlane.f32.xlu0 %v469_v37  ;;  %v402_v41 = vmul.f32 0.0078125, %v394_v40 }
  0xf4   : > { %v1600_v25 = vsub.f32 %v1508_v26, %v402_v41  ;;  %v1603_v43 = vsub.f32 %v1517_v30, %v402_v41  ;;  %v622_v30 = vld [vmem:[#allocation8 + $0x38] sm:$0xff] }
  0xf5   : > { %949 = vmatpush.msra.mxu2 %v622_v30  ;;  %655 = vmatpush.msra.mxu0 %v622_v30 }
  0xf6   : > { %v426_v49 = vmul.f32 %v1600_v25, %v1600_v25  ;;  %v458_v53 = vmul.f32 %v1603_v43, %v1603_v43 }
  0xf7   : > { %950 = vmatpush.msra.mxu2 %v621_v55  ;;  %656 = vmatpush.msra.mxu0 %v621_v55 }
  0xf8   : > { %v440_v52 = vsel %vm342_vm0, %v426_v49, 0.0  ;;  %v472_v26 = vsel %vm342_vm0, %v458_v53, 0.0 }
  0xf9   : > { %485 = vadd.xlane.f32.xlu2 %v484_v47  ;;  %453 = vadd.xlane.f32.xlu1 %v452_v48 }
  0xfa   : > { %441 = vadd.xlane.f32.xlu0 %v440_v52  ;;  %951 = vmatpush.msra.mxu2 %v620_v57 }
  0xfb   : > { %657 = vmatpush.msra.mxu0 %v620_v57 }
  0xfc   : > { %952 = vmatpush.msra.mxu2 %v619_v60 }
  0xfd   : > { %658 = vmatpush.msra.mxu0 %v619_v60 }
  0xfe   : > { %953 = vmatpush.msra.mxu2 %v618_v62 }
  0xff   : > { %659 = vmatpush.msra.mxu0 %v618_v62 }
 0x100   : > { %954 = vmatpush.msra.mxu2 %v617_v2 }
 0x101   : > { %473 = vadd.xlane.f32.xlu1 %v472_v26  ;;  %660 = vmatpush.msra.mxu0 %v617_v2 }
 0x102   : > { %955 = vmatpush.msra.mxu2 %v616_v4 }
 0x103   : > { %661 = vmatpush.msra.mxu0 %v616_v4 }
 0x104   : > { %956 = vmatpush.msra.mxu2 %v615_v6 }
 0x105   : > { %662 = vmatpush.msra.mxu0 %v615_v6 }
 0x14c   : > { %v477_v8 = vpop.xlane.xlu2 %476  ;;  %v445_v9 = vpop.xlane.xlu1 %444 }
 0x14d   : > { %v433_v10 = vpop.xlane.xlu0 %432  ;;  %v491_v11 = vadd.f32 %v477_v8, %v445_v9 }
 0x14f   : > { %v499_v12 = vmul.f32 0.0078125, %v491_v11 }
 0x151   : > { %v507_v13 = vadd.f32 1e-05, %v499_v12 }
 0x153   : > { %1043 = vrsqrt.f32 %v507_v13  ;;  %vm557_vm2 = vweird.f32 %v507_v13 }
 0x154   : > { %v448_v17 = vpop.xlane.xlu2 %447  ;;  %v465_v21 = vpop.xlane.xlu1 %464 }
 0x155   : > { %v480_v22 = vpop.xlane.xlu0 %479  ;;  %v487_v27 = vadd.f32 %v465_v21, %v433_v10 }
 0x156   : > { %v492_v28 = vadd.f32 %v480_v22, %v448_v17 }
 0x157   : > { %v495_v14 = vmul.f32 0.0078125, %v487_v27 }
 0x158   : > { %v500_v31 = vmul.f32 0.0078125, %v492_v28 }
 0x159   : > { %v1044_v19 = vpop.eup %1043  ;;  %v503_v32 = vadd.f32 1e-05, %v495_v14 }
 0x15a   : > { %v552_v33 = vmul.f32 %v1044_v19, %v507_v13  ;;  %v508_v20 = vadd.f32 1e-05, %v500_v31  ;;  %vm558_vm1 = vweird.f32 %v1044_v19 }
 0x15b   : > { %1045 = vrsqrt.f32 %v503_v32  ;;  %vm559_vm3 = vmor %vm557_vm2, %vm558_vm1  ;;  %vm517_vm6 = vweird.f32 %v503_v32 }
 0x15c   : > { %v553_v34 = vmul.f32 %v1044_v19, %v552_v33  ;;  %1047 = vrsqrt.f32 %v508_v20  ;;  %v468_v36 = vpop.xlane.xlu2 %467  ;;  %v436_v37 = vpop.xlane.xlu1 %435  ;;  %vm567_vm7 = vweird.f32 %v508_v20 }
 0x15d   : > { %v451_v38 = vpop.xlane.xlu0 %450  ;;  %v488_v39 = vadd.f32 %v468_v36, %v436_v37 }
 0x15e   : > { %v554_v40 = vmul.f32 0.5, %v553_v34 }
 0x15f   : > { %v496_v41 = vmul.f32 0.0078125, %v488_v39 }
 0x160   : > { %v555_v42 = vsub.f32 1.5, %v554_v40 }
 0x161   : > { %v1046_v24 = vpop.eup %1045  ;;  %v1613_v47 = vadd.f32 1e-05, %v496_v41 }
 0x162   : > { %v1048_v48 = vpop.eup %1047  ;;  %v512_v49 = vmul.f32 %v1046_v24, %v503_v32  ;;  %v556_v52 = vmul.f32 %v1044_v19, %v555_v42  ;;  %vm518_vm4 = vweird.f32 %v1046_v24 }
 0x163   : > { %v562_v53 = vmul.f32 %v1048_v48, %v508_v20  ;;  %1049 = vrsqrt.f32 %v1613_v47  ;;  %vm568_vm5 = vweird.f32 %v1048_v48  ;;  %vm519_vm8 = vmor %vm517_vm6, %vm518_vm4  ;;  %vm527_vm11 = vweird.f32 %v1613_v47 }
 0x164   : > { %v513_v26 = vmul.f32 %v1046_v24, %v512_v49  ;;  %v439_v30 = vpop.xlane.xlu2 %438  ;;  %v483_v54 = vpop.xlane.xlu1 %482  ;;  %v560_v55 = vsel %vm559_vm3, %v1044_v19, %v556_v52  ;;  %vm569_vm9 = vmor %vm567_vm7, %vm568_vm5 }
 0x165   : > { %v563_v56 = vmul.f32 %v1048_v48, %v562_v53  ;;  %v471_v57 = vpop.xlane.xlu0 %470  ;;  %v493_v58 = vadd.f32 %v483_v54, %v451_v38  ;;  %v603_v60 = vmul.f32 %v560_v55, %v1523_v45  ;;  %v595_v61 = vmul.f32 %v560_v55, %v1521_v44 }
 0x166   : > { %v514_v62 = vmul.f32 0.5, %v513_v26  ;;  %v489_v63 = vadd.f32 %v471_v57, %v439_v30 }
 0x167   : > { %v564_v2 = vmul.f32 0.5, %v563_v56  ;;  %v501_v3 = vmul.f32 0.0078125, %v493_v58  ;;  %928 = vmatmul.msk.f32.vlgmr.msra.gmra.mxu2 %vm342_vm0, %v603_v60  ;;  %936 = vmatmul.msk.f32.vlgmr.msra.gmra.mxu3 %vm342_vm0, %v595_v61 }
 0x168   : > { %v515_v4 = vsub.f32 1.5, %v514_v62  ;;  %v497_v5 = vmul.f32 0.0078125, %v489_v63 }
 0x169   : > { %v1050_v6 = vpop.eup %1049  ;;  %v565_v7 = vsub.f32 1.5, %v564_v2  ;;  %v509_v8 = vadd.f32 1e-05, %v501_v3 }
 0x16a   : > { %v522_v45 = vmul.f32 %v1050_v6, %v1613_v47  ;;  %v505_v9 = vadd.f32 1e-05, %v497_v5  ;;  %v516_v44 = vmul.f32 %v1046_v24, %v515_v4  ;;  %vm528_vm10 = vweird.f32 %v1050_v6 }
 0x16b   : > { %1051 = vrsqrt.f32 %v509_v8  ;;  %v566_v10 = vmul.f32 %v1048_v48, %v565_v7  ;;  %vm529_vm12 = vmor %vm527_vm11, %vm528_vm10  ;;  %vm577_vm15 = vweird.f32 %v509_v8 }
 0x16c   : > { %v523_v11 = vmul.f32 %v1050_v6, %v522_v45  ;;  %1053 = vrsqrt.f32 %v505_v9  ;;  %v486_v12 = vpop.xlane.xlu2 %485  ;;  %v454_v13 = vpop.xlane.xlu1 %453  ;;  %v520_v17 = vsel %vm519_vm8, %v1046_v24, %v516_v44  ;;  %vm537_vm1 = vweird.f32 %v505_v9 }
 0x16d   : > { %v494_v21 = vadd.f32 %v486_v12, %v454_v13  ;;  %v599_v22 = vmul.f32 %v520_v17, %v1533_v50  ;;  %v570_v27 = vsel %vm569_vm9, %v1048_v48, %v566_v10  ;;  %v591_v28 = vmul.f32 %v520_v17, %v1525_v46 }
 0x16e   : > { %v524_v14 = vmul.f32 0.5, %v523_v11  ;;  %v604_v31 = vmul.f32 %v570_v27, %v1542_v59  ;;  %v596_v19 = vmul.f32 %v570_v27, %v1536_v51  ;;  %v442_v59 = vpop.xlane.xlu0 %441 }
 0x16f   : > { %v502_v32 = vmul.f32 0.0078125, %v494_v21  ;;  %924 = vmatmul.msk.f32.vlgmr.msra.gmra.mxu0 %vm342_vm0, %v599_v22  ;;  %932 = vmatmul.msk.f32.vlgmr.msra.gmra.mxu1 %vm342_vm0, %v591_v28 }
 0x170   : > { %v525_v33 = vsub.f32 1.5, %v524_v14  ;;  %929 = vmatmul.msk.f32.gmra.mxu2 %vm342_vm0, %v604_v31  ;;  %937 = vmatmul.msk.f32.gmra.mxu3 %vm342_vm0, %v596_v19 }
 0x171   : > { %v1052_v50 = vpop.eup %1051  ;;  %v510_v20 = vadd.f32 1e-05, %v502_v32 }
 0x172   : > { %v1054_v34 = vpop.eup %1053  ;;  %v572_v46 = vmul.f32 %v1052_v50, %v509_v8  ;;  %v526_v36 = vmul.f32 %v1050_v6, %v525_v33  ;;  %vm578_vm13 = vweird.f32 %v1052_v50 }
 0x173   : > { %v532_v51 = vmul.f32 %v1054_v34, %v505_v9  ;;  %1055 = vrsqrt.f32 %v510_v20  ;;  %vm538_vm14 = vweird.f32 %v1054_v34  ;;  %vm579_vm2 = vmor %vm577_vm15, %vm578_vm13  ;;  %vm587_vm5 = vweird.f32 %v510_v20 }
 0x174   : > { %v573_v37 = vmul.f32 %v1052_v50, %v572_v46  ;;  %v474_v38 = vpop.xlane.xlu1 %473  ;;  %v530_v39 = vsel %vm529_vm12, %v1050_v6, %v526_v36  ;;  %vm539_vm3 = vmor %vm537_vm1, %vm538_vm14 }
 0x175   : > { %v533_v40 = vmul.f32 %v1054_v34, %v532_v51  ;;  %v490_v41 = vadd.f32 %v474_v38, %v442_v59  ;;  %v600_v42 = vmul.f32 %v530_v39, %v1554_v1  ;;  %v592_v24 = vmul.f32 %v530_v39, %v1551_v0 }
 0x176   : > { %v574_v48 = vmul.f32 0.5, %v573_v37 }
 0x177   : > { %v534_v49 = vmul.f32 0.5, %v533_v40  ;;  %v498_v52 = vmul.f32 0.0078125, %v490_v41  ;;  %925 = vmatmul.msk.f32.gmra.mxu0 %vm342_vm0, %v600_v42  ;;  %933 = vmatmul.msk.f32.gmra.mxu1 %vm342_vm0, %v592_v24 }
 0x178   : > { %v575_v47 = vsub.f32 1.5, %v574_v48 }
 0x179   : > { %v1056_v53 = vpop.eup %1055  ;;  %v535_v26 = vsub.f32 1.5, %v534_v49  ;;  %v506_v30 = vadd.f32 1e-05, %v498_v52 }
 0x17a   : > { %v582_v54 = vmul.f32 %v1056_v53, %v510_v20  ;;  %v576_v55 = vmul.f32 %v1052_v50, %v575_v47  ;;  %vm588_vm4 = vweird.f32 %v1056_v53 }
 0x17b   : > { %1057 = vrsqrt.f32 %v506_v30  ;;  %v536_v0 = vmul.f32 %v1054_v34, %v535_v26  ;;  %vm589_vm6 = vmor %vm587_vm5, %vm588_vm4  ;;  %vm547_vm8 = vweird.f32 %v506_v30 }
 0x17c   : > { %v583_v1 = vmul.f32 %v1056_v53, %v582_v54  ;;  %v580_v56 = vsel %vm579_vm2, %v1052_v50, %v576_v55 }
 0x17d   : > { %v540_v57 = vsel %vm539_vm3, %v1054_v34, %v536_v0  ;;  %v605_v58 = vmul.f32 %v580_v56, %v1577_v29  ;;  %v597_v60 = vmul.f32 %v580_v56, %v1564_v15 }
 0x17e   : > { %v584_v61 = vmul.f32 0.5, %v583_v1  ;;  %v601_v62 = vmul.f32 %v540_v57, %v1574_v23  ;;  %v593_v63 = vmul.f32 %v540_v57, %v1567_v16 }
 0x17f   : > { %930 = vmatmul.msk.f32.gmra.mxu2 %vm342_vm0, %v605_v58  ;;  %938 = vmatmul.msk.f32.gmra.mxu3 %vm342_vm0, %v597_v60 }
 0x180   : > { %v585_v2 = vsub.f32 1.5, %v584_v61  ;;  %926 = vmatmul.msk.f32.gmra.mxu0 %vm342_vm0, %v601_v62  ;;  %934 = vmatmul.msk.f32.gmra.mxu1 %vm342_vm0, %v593_v63 }
 0x181   : > { %v1058_v3 = vpop.eup %1057 }
 0x182   : > { %v542_v29 = vmul.f32 %v1058_v3, %v506_v30  ;;  %v586_v4 = vmul.f32 %v1056_v53, %v585_v2  ;;  %vm548_vm7 = vweird.f32 %v1058_v3 }
 0x183   : > { %vm549_vm9 = vmor %vm547_vm8, %vm548_vm7 }
 0x184   : > { %v543_v15 = vmul.f32 %v1058_v3, %v542_v29  ;;  %v590_v5 = vsel %vm589_vm6, %v1056_v53, %v586_v4 }
 0x185   : > { %v606_v23 = vmul.f32 %v590_v5, %v1590_v35  ;;  %v598_v16 = vmul.f32 %v590_v5, %v1587_v18  ;;  %v1042_v18 = vld [vmem:[%s1702_s4] ss:$0 sm:$0xff] }
 0x186   : > { %v544_v6 = vmul.f32 0.5, %v543_v15 }
 0x187   : > { %931 = vmatmul.msk.f32.gmra.mxu2 %vm342_vm0, %v606_v23  ;;  %939 = vmatmul.msk.f32.gmra.mxu3 %vm342_vm0, %v598_v16 }
 0x188   : > { %v545_v7 = vsub.f32 1.5, %v544_v6 }
 0x18a   : > { %v546_v8 = vmul.f32 %v1058_v3, %v545_v7 }
 0x18c   : > { %v550_v45 = vsel %vm549_vm9, %v1058_v3, %v546_v8 }
 0x18d   : > { %v602_v9 = vmul.f32 %v550_v45, %v1603_v43  ;;  %v594_v44 = vmul.f32 %v550_v45, %v1600_v25 }
 0x18f   : > { %927 = vmatmul.msk.f32.gmra.mxu0 %vm342_vm0, %v602_v9  ;;  %935 = vmatmul.msk.f32.gmra.mxu1 %vm342_vm0, %v594_v44 }
 0x1ea   : > { %v676_v35 = vpop.f32.mrf.mxu2  ;;  %v741_v10 = vpop.f32.mrf.mxu3 }
 0x1eb   : > { %v742_v11 = vadd.f32 %v741_v10, %v676_v35 }
 0x1ec   : > { %v664_v12 = vpop.f32.mrf.mxu0  ;;  %v729_v13 = vpop.f32.mrf.mxu1 }
 0x1ed   : > { %v761_v17 = vadd.f32 %v1042_v18, %v742_v11  ;;  %v730_v21 = vadd.f32 %v729_v13, %v664_v12 }
 0x1ef   : > { %769 = vst [vmem:[%s1654_s28 + $0x20] sm:$0xff] %v761_v17  ;;  %v757_v25 = vadd.f32 %v1042_v18, %v730_v21 }
 0x1f1   : > { %765 = vst [vmem:[%s1654_s28] sm:$0xff] %v757_v25 }
 0x1f3   : > { %v679_v43 = vpop.f32.mrf.mxu2  ;;  %v744_v22 = vpop.f32.mrf.mxu3 }
 0x1f4   : > { %v745_v27 = vadd.f32 %v744_v22, %v679_v43  ;;  %v667_v28 = vpop.f32.mrf.mxu0  ;;  %v732_v14 = vpop.f32.mrf.mxu1 }
 0x1f5   : > { %v733_v31 = vadd.f32 %v732_v14, %v667_v28 }
 0x1f6   : > { %v762_v19 = vadd.f32 %v1042_v18, %v745_v27 }
 0x1f7   : > { %v758_v32 = vadd.f32 %v1042_v18, %v733_v31 }
 0x1f8   : > { %770 = vst [vmem:[%s1654_s28 + $0x28] sm:$0xff] %v762_v19 }
 0x1f9   : > { %766 = vst [vmem:[%s1654_s28 + $0x8] sm:$0xff] %v758_v32 }
 0x1fd   : > { %v670_v33 = vpop.f32.mrf.mxu0  ;;  %v735_v50 = vpop.f32.mrf.mxu1 }
 0x1fe   : > { %v736_v20 = vadd.f32 %v735_v50, %v670_v33 }
 0x200   : > { %v759_v34 = vadd.f32 %v1042_v18, %v736_v20 }
 0x202   : > { %767 = vst [vmem:[%s1654_s28 + $0x10] sm:$0xff] %v759_v34  ;;  %v682_v46 = vpop.f32.mrf.mxu2  ;;  %v747_v59 = vpop.f32.mrf.mxu3 }
 0x203   : > { %v748_v36 = vadd.f32 %v747_v59, %v682_v46 }
 0x205   : > { %v763_v51 = vadd.f32 %v1042_v18, %v748_v36 }
 0x207   : > { %771 = vst [vmem:[%s1654_s28 + $0x30] sm:$0xff] %v763_v51 }
 0x20a   : > { %v685_v37 = vpop.f32.mrf.mxu2  ;;  %v750_v38 = vpop.f32.mrf.mxu3 }
 0x20b   : > { %v751_v39 = vadd.f32 %v750_v38, %v685_v37 }
 0x20c   : > { %v673_v40 = vpop.f32.mrf.mxu0  ;;  %v738_v41 = vpop.f32.mrf.mxu1 }
 0x20d   : > { %v764_v42 = vadd.f32 %v1042_v18, %v751_v39  ;;  %v739_v24 = vadd.f32 %v738_v41, %v673_v40 }
 0x20f   : > { %772 = vst [vmem:[%s1654_s28 + $0x38] sm:$0xff] %v764_v42  ;;  %v760_v48 = vadd.f32 %v1042_v18, %v739_v24 }
 0x211   : > { %768 = vst [vmem:[%s1654_s28 + $0x18] sm:$0xff] %v760_v48 }
 0x212   : > { %1206 = shalt.err (!%p1203_p9)
}
 0x213   : > { %s1264_s0 = smov 128   ;;  %s1265_s12 = smov 8  }
 0x214   : > { %977 = dma.vmem_to_hbm [thread:$0]  (%p1368_p3), %s787_s3, 1024, %s789_s30, %s774_s22, %s1264_s0, %s1264_s0, %s1265_s12  }
 0x215 PF: > { %s803_s20 = sand.u32 1, %s1245_s18   ;;  %p1724_p12 = scmp.ge.s32.totalorder %s1257_s21, 2 }
 0x216   : > { %s804_s29 = scalar_lea.sflag [#allocation4], %s803_s20 }
 0x217   : > { %p994_p13 = pnand %p1724_p12, %p1331_p6 }
 0x219   : > { %p995_p0 = pneg %p994_p13 }
 0x21b   : > { %1240 = dma.done.wait (%p995_p0), %s804_s29, 1024  }
 0x21c   : > { %1242 = vsyncadd (%p995_p0), %s804_s29, 4294966272  ;;  %s1725_s13 = sld [smem:[#allocation16_spill]]  ;;  %p22_p5 = scmp.ge.s32.totalorder %s1358_s14, 4  }
 0x21d   : > { %s1726_s20 = sld [smem:[#allocation17_spill]]  ;;  %s1727_s18 = smov %s1249_s19 }
 0x21e   : > { %s1729_s21 = smov %s1358_s14  ;;  %24 = sbr.rel (!%p22_p5) target bundleno = 12 (0xc), region = 106 }
 0x222   : > { %s1728_s19 = smov %s1725_s13 }
 0x223   :  { %810 = vsyncpa [#allocation3], 1 }
 0x224   :  { %812 = vsyncpa [#allocation3 + $0x1], 1 }
 0x225   :  { %813 = vsyncpa [#allocation6], 1 }
 0x226   :  { %815 = vsyncpa [#allocation6 + $0x1], 1 }
 0x227   :  { %816 = vsyncpa [#allocation9], 1 }
 0x228   :  { %817 = vsyncpa [#allocation4], 1 }
 0x229   :  { %819 = vsyncpa [#allocation4 + $0x1], 1 }

</bundles_post_ra>
